<compile_context>
chip_gen: v7x
topology: tpu7x:2x2x1
jax: 0.10.0
libtpu: 0.0.40
codegen_flags: <defaults>
</compile_context>

<pallas_src>
import math
import jax
import jax.numpy as jnp
from jax.experimental import pallas as pl
from jax.experimental.pallas import tpu as pltpu


_VMEM_LIMIT_BYTES = 32 * 1024 * 1024   # kernel footprint is ~3 MB; plenty of slack
_TARGET_TILE_ROWS = 8192               # >= ~1.5 MB of bf16 activations per grid step
_MIN_GRID_STEPS = 4                    # keep pipeline overlap / both TCs on v7x


# --------------------------------------------------------------------------
# Helpers
# --------------------------------------------------------------------------
def _round_up(x, m):
    return ((x + m - 1) // m) * m


def _cdiv(a, b):
    return -(-a // b)


def _row_tile(n_rows, base, target=_TARGET_TILE_ROWS):
    """Row tile: a multiple of `base`, ~`target` rows, but keep the grid at
    >= _MIN_GRID_STEPS steps whenever there are enough rows."""
    steps = max(_MIN_GRID_STEPS, _cdiv(n_rows, target))
    tile = _round_up(_cdiv(n_rows, steps), base)
    return max(base, min(tile, _round_up(n_rows, base)))


def _quantize_roundtrip(x, dtype):
    """Round-trip through the streaming dtype so the Pallas kernels (which
    stream `dtype`) and the pure-f32 references see identical values."""
    return x.astype(dtype).astype(jnp.float32)


# --------------------------------------------------------------------------
# Pallas kernels
# --------------------------------------------------------------------------
def _filter_factory_kernel(x_ref, prior_ref, w_ref, rep_ref, sel_ref,
                           r_ref, p_ref):
    # x: (TN, S+F+1) bf16   prior: (TN, K) f32 (channel-cyclic, pinned)
    # w: (S+F+1, K + K*O) bf16 block-diag [[cls_w,0],[0,w_cat],[0,mix_b]]
    # rep: (K, K*O) f32     sel: (K*O, O) f32     r: (TN, O)   p: (TN, K)
    k_st = prior_ref.shape[-1]

    # Single MXU pass: classifier logits + per-state mix (bias folded via the
    # ones column of x).
    y_all = jnp.dot(x_ref[...], w_ref[...], preferred_element_type=jnp.float32)
    logits = y_all[:, :k_st] + prior_ref[...]
    y = y_all[:, k_st:]                                  # (TN, K*O)

    # Exact softmax over the state axis (p is a returned quantity).
    m = jnp.max(logits, axis=-1, keepdims=True)
    e = jnp.exp(logits - m)
    p = e / jnp.sum(e, axis=-1, keepdims=True)
    p_ref[...] = p.astype(p_ref.dtype)

    # State-weighted sum on the MXU: expand p across the K*O lanes, one
    # full-width VPU multiply, then a 0/1 selection matmul back to O lanes.
    p_exp = jnp.dot(p, rep_ref[...], preferred_element_type=jnp.float32)
    r = jnp.dot(p_exp * y, sel_ref[...], preferred_element_type=jnp.float32)
    r_ref[...] = r.astype(r_ref.dtype)
    # TODO(synk): for v5e store-slot relief, emit a packed (TN, O+K) output
    # when the downstream consumer can accept the fused layout.


def _filter_apply_kernel(p_ref, x_ref, w_ref, rep_ref, sel_ref, r_ref):
    # need_classifier=False path: p supplied externally (streamed f32).
    # x: (TN, F+1) bf16 = [corr | 1]   w: (F+1, K*O) bf16 = [w_cat ; mix_b]
    p = p_ref[...].astype(jnp.float32)
    y = jnp.dot(x_ref[...], w_ref[...], preferred_element_type=jnp.float32)
    p_exp = jnp.dot(p, rep_ref[...], preferred_element_type=jnp.float32)
    r = jnp.dot(p_exp * y, sel_ref[...], preferred_element_type=jnp.float32)
    r_ref[...] = r.astype(r_ref.dtype)


def _linear_kernel(x_ref, w_ref, b_ref, o_ref):
    # num_state == 1 path: plain Linear(feat_dim -> out_dim)
    o_ref[...] = (jnp.dot(x_ref[...], w_ref[...],
                          preferred_element_type=jnp.float32)
                  + b_ref[...]).astype(o_ref.dtype)


# --------------------------------------------------------------------------
# Module wrapper
# --------------------------------------------------------------------------
class FilterFactoryPallas:
    """JAX/Pallas port of FilterFactory.  Parameters are initialized
    deterministically in-script (shapes match the PyTorch __init__)."""

    def __init__(self, key, feat_dim, seq_len, num_channel, out_dim,
                 num_state=1, need_classifier=True,
                 stream_dtype=jnp.bfloat16):
        self.feat_dim = feat_dim
        self.seq_len = seq_len
        self.num_channel = num_channel
        self.out_dim = out_dim
        self.num_state = num_state
        self.need_classifier = need_classifier
        self.stream_dtype = stream_dtype

        k = jax.random.split(key, 6)
        S, F, K, O = seq_len, feat_dim, num_state, out_dim

        if num_state > 1 and need_classifier:
            b_cls = 1.0 / math.sqrt(seq_len)
            # classifier: Linear(seq_len, num_state, bias=False); stored (S, K)
            self.cls_w_t = _quantize_roundtrip(
                jax.random.uniform(k[0], (S, K), jnp.float32, -b_cls, b_cls),
                stream_dtype)
            self.bias = jax.random.uniform(k[1], (K,), jnp.float32,
                                           -b_cls, b_cls)
            b_bs = 1.0 / math.sqrt(num_state)
            self.basic_state = jax.random.uniform(
                k[2], (num_channel, K), jnp.float32, -b_bs, b_bs)
            # prior = bias + basic_state is parameter-only: precompute (C, K).
            self.prior_cb = self.bias[None, :] + self.basic_state

        b_mh = 1.0 / math.sqrt(feat_dim)
        if num_state == 1:
            self.mix_head_w = _quantize_roundtrip(
                jax.random.uniform(k[3], (F, O), jnp.float32, -b_mh, b_mh),
                stream_dtype)
            self.mix_head_b = jax.random.uniform(k[4], (1, O), jnp.float32,
                                                 -b_mh, b_mh)
            self.mix_head_w_st = self.mix_head_w.astype(stream_dtype)
        else:
            # mix_w[s] is the state-s matrix W_s (feat_dim, out_dim).
            self.mix_w = _quantize_roundtrip(
                jax.random.uniform(k[3], (K, F, O), jnp.float32, -b_mh, b_mh),
                stream_dtype)
            self.mix_b = _quantize_roundtrip(
                jax.random.uniform(k[4], (K, O), jnp.float32, -b_mh, b_mh),
                stream_dtype)
            # Lane-dense fused weight (F, K*O); column s*O+j == W_s[:, j].
            self.w_cat = jnp.transpose(self.mix_w, (1, 0, 2)).reshape(F, K * O)
            # Bias trick: [w_cat ; mix_b] paired with a ones column on the
            # activation side folds the mixing bias into the same MXU pass.
            self.w_mix = jnp.concatenate(
                [self.w_cat, self.mix_b.reshape(1, K * O)],
                axis=0).astype(stream_dtype)                       # (F+1, K*O)
            # Constant repeat / selection matrices so the state-weighted sum
            # runs as r = ((p @ R) * y) @ Sel on the MXU (no per-state VPU loop).
            self.rep_mat = jnp.kron(jnp.eye(K, dtype=jnp.float32),
                                    jnp.ones((1, O), jnp.float32))  # (K, K*O)
            self.sel_mat = jnp.kron(jnp.ones((K, 1), jnp.float32),
                                    jnp.eye(O, dtype=jnp.float32))  # (K*O, O)
            if need_classifier:
                # Block-diagonal weight for the single fused MXU pass:
                #   [lookback | corr | 1] @ [[cls_w, 0], [0, w_cat], [0, mix_b]]
                top = jnp.concatenate(
                    [self.cls_w_t, jnp.zeros((S, K * O), jnp.float32)], axis=-1)
                bot = jnp.concatenate(
                    [jnp.zeros((F + 1, K), jnp.float32),
                     jnp.concatenate([self.w_cat,
                                      self.mix_b.reshape(1, K * O)], axis=0)],
                    axis=-1)
                self.w_big = jnp.concatenate(
                    [top, bot], axis=0).astype(stream_dtype)   # (S+F+1, K+K*O)

    # ---------------- num_state == 1 path ----------------
    def _forward_single_state(self, corr_feat):
        B, C, F = corr_feat.shape
        O = self.out_dim
        N = B * C
        TN = _row_tile(N, 8)
        grid = _cdiv(N, TN)
        N_pad = grid * TN

        x = corr_feat.reshape(N, F).astype(self.stream_dtype)
        if N_pad != N:
            x = jnp.pad(x, ((0, N_pad - N), (0, 0)))

        r = pl.pallas_call(
            _linear_kernel,
            out_shape=jax.ShapeDtypeStruct((N_pad, O), jnp.float32),
            grid_spec=pl.GridSpec(
                grid=(grid,),
                in_specs=[pl.BlockSpec((TN, F), lambda i: (i, 0)),
                          pl.BlockSpec((F, O), lambda i: (0, 0)),
                          pl.BlockSpec((1, O), lambda i: (0, 0))],
                out_specs=pl.BlockSpec((TN, O), lambda i: (i, 0)),
            ),
            compiler_params=pltpu.CompilerParams(
                dimension_semantics=("parallel",),
                vmem_limit_bytes=_VMEM_LIMIT_BYTES),
        )(x, self.mix_head_w_st, self.mix_head_b)
        return r[:N].reshape(B, C, O), None

    # ---------------- num_state > 1, external p ----------------
    def _forward_given_p(self, corr_feat, p):
        B, C, F = corr_feat.shape
        O, K = self.out_dim, self.num_state
        N = B * C
        TN = _row_tile(N, 8)
        grid = _cdiv(N, TN)
        N_pad = grid * TN

        xc = jnp.concatenate(
            [corr_feat.reshape(N, F).astype(self.stream_dtype),
             jnp.ones((N, 1), self.stream_dtype)], axis=-1)     # bias trick
        p_flat = p.reshape(N, K).astype(jnp.float32)
        if N_pad != N:
            xc = jnp.pad(xc, ((0, N_pad - N), (0, 0)))
            p_flat = jnp.pad(p_flat, ((0, N_pad - N), (0, 0)))

        r = pl.pallas_call(
            _filter_apply_kernel,
            out_shape=jax.ShapeDtypeStruct((N_pad, O), jnp.float32),
            grid_spec=pl.GridSpec(
                grid=(grid,),
                in_specs=[pl.BlockSpec((TN, K), lambda i: (i, 0)),
                          pl.BlockSpec((TN, F + 1), lambda i: (i, 0)),
                          pl.BlockSpec((F + 1, K * O), lambda i: (0, 0)),
                          pl.BlockSpec((K, K * O), lambda i: (0, 0)),
                          pl.BlockSpec((K * O, O), lambda i: (0, 0))],
                out_specs=pl.BlockSpec((TN, O), lambda i: (i, 0)),
            ),
            compiler_params=pltpu.CompilerParams(
                dimension_semantics=("parallel",),
                vmem_limit_bytes=_VMEM_LIMIT_BYTES),
        )(p_flat, xc, self.w_mix, self.rep_mat, self.sel_mat)
        return r[:N].reshape(B, C, O), p

    # ---------------- main forward ----------------
    def __call__(self, lookback_seq, corr_feat, p=None):
        if self.num_state == 1:
            return self._forward_single_state(corr_feat)
        if not self.need_classifier:
            assert p is not None, "p must be supplied when need_classifier=False"
            return self._forward_given_p(corr_feat, p)

        B, C, S = lookback_seq.shape
        F, O, K = self.feat_dim, self.out_dim, self.num_state
        N = B * C

        # Row tile: multiple of lcm(8, C) so every tile start is channel-aligned
        # and the per-channel prior repeats with period C inside each tile.
        base = 8 * C // math.gcd(8, C)
        TN = _row_tile(N, base)
        grid = _cdiv(N, TN)
        N_pad = grid * TN

        # One fused, lane-dense bf16 activation stream: [lookback | corr | 1].
        x = jnp.concatenate(
            [lookback_seq.reshape(N, S).astype(self.stream_dtype),
             corr_feat.reshape(N, F).astype(self.stream_dtype),
             jnp.ones((N, 1), self.stream_dtype)], axis=-1)
        if N_pad != N:
            # Zero rows: padded tail stays finite through exp()/softmax.
            x = jnp.pad(x, ((0, N_pad - N), (0, 0)))

        # Channel-cyclic prior for ONE tile (TN, K); pinned in VMEM.
        prior_tile = jnp.tile(self.prior_cb, (TN // C, 1))

        r_pad, p_pad = pl.pallas_call(
            _filter_factory_kernel,
            out_shape=(jax.ShapeDtypeStruct((N_pad, O), jnp.float32),
                       jax.ShapeDtypeStruct((N_pad, K), jnp.float32)),
            grid_spec=pl.GridSpec(
                grid=(grid,),
                in_specs=[pl.BlockSpec((TN, S + F + 1), lambda i: (i, 0)),
                          pl.BlockSpec((TN, K), lambda i: (0, 0)),          # prior
                          pl.BlockSpec((S + F + 1, K + K * O),
                                       lambda i: (0, 0)),                   # W
                          pl.BlockSpec((K, K * O), lambda i: (0, 0)),       # R
                          pl.BlockSpec((K * O, O), lambda i: (0, 0))],      # Sel
                out_specs=[pl.BlockSpec((TN, O), lambda i: (i, 0)),
                           pl.BlockSpec((TN, K), lambda i: (i, 0))],
            ),
            compiler_params=pltpu.CompilerParams(
                dimension_semantics=("parallel",),   # rows independent: 2 TCs on v7x
                vmem_limit_bytes=_VMEM_LIMIT_BYTES),
        )(x, prior_tile, self.w_big, self.rep_mat, self.sel_mat)

        r = r_pad[:N].reshape(B, C, O)
        p_out = p_pad[:N].reshape(B, C, 1, K)   # matches torch's unsqueeze(-2)
        return r, p_out


# --------------------------------------------------------------------------
# Pure-JAX references (mirror the PyTorch forward exactly, f32 math)
# --------------------------------------------------------------------------
def _mix_reference(mod, p4, corr_feat):
    B, C = corr_feat.shape[:2]
    corr = corr_feat.astype(jnp.float32)
    w_flat = mod.mix_w.reshape(mod.num_state, -1)                  # (K, F*O)
    weight = (p4 @ w_flat).reshape(B, C, mod.feat_dim, mod.out_dim)
    bias = (p4 @ mod.mix_b).reshape(B, C, mod.out_dim)
    return (corr[..., None, :] @ weight)[..., 0, :] + bias


def _reference_classifier(mod, lookback_seq, corr_feat):
    lb = lookback_seq.astype(jnp.float32)
    logits = (mod.bias + mod.basic_state
              + jnp.einsum('bcs,sk->bck', lb, mod.cls_w_t))
    p4 = jax.nn.softmax(logits, axis=-1)[..., None, :]             # (B,C,1,K)
    return _mix_reference(mod, p4, corr_feat), p4


# --------------------------------------------------------------------------
if __name__ == "__main__":
    B, C = 2, 4
    seq_len, feat_dim, out_dim, num_state = 8, 32, 16, 4

    key = jax.random.PRNGKey(0)
    k_param, k_lb, k_cf, k_p = jax.random.split(key, 4)

    # Round-trip the activations through bf16 once so the kernels (bf16
    # streaming, f32 accumulation) and the f32 references use identical values.
    lookback_seq = _quantize_roundtrip(
        jax.random.normal(k_lb, (B, C, seq_len), jnp.float32), jnp.bfloat16)
    corr_feat = _quantize_roundtrip(
        jax.random.normal(k_cf, (B, C, feat_dim), jnp.float32), jnp.bfloat16)

    # --- num_state > 1, classifier path
    mod = FilterFactoryPallas(k_param, feat_dim=feat_dim, seq_len=seq_len,
                              num_channel=C, out_dim=out_dim,
                              num_state=num_state, need_classifier=True)
    r, p = mod(lookback_seq, corr_feat)
    jax.block_until_ready((r, p))
    r_ref, p_ref = _reference_classifier(mod, lookback_seq, corr_feat)
    assert r.shape == (B, C, out_dim) and p.shape == (B, C, 1, num_state)
    assert jnp.allclose(r, r_ref, atol=5e-3, rtol=5e-3)
    assert jnp.allclose(p, p_ref, atol=5e-3, rtol=5e-3)

    # --- num_state > 1, externally supplied p (need_classifier=False)
    mod_np = FilterFactoryPallas(k_param, feat_dim=feat_dim, seq_len=seq_len,
                                 num_channel=C, out_dim=out_dim,
                                 num_state=num_state, need_classifier=False)
    p_ext = jax.nn.softmax(
        jax.random.normal(k_p, (B, C, 1, num_state), jnp.float32), axis=-1)
    r2, p2 = mod_np(lookback_seq, corr_feat, p_ext)
    jax.block_until_ready(r2)
    r2_ref = _mix_reference(mod_np, p_ext, corr_feat)
    assert jnp.allclose(r2, r2_ref, atol=5e-3, rtol=5e-3)

    # --- num_state == 1 path (plain Linear)
    mod1 = FilterFactoryPallas(k_param, feat_dim=feat_dim, seq_len=seq_len,
                               num_channel=C, out_dim=out_dim, num_state=1)
    r1, p1 = mod1(lookback_seq, corr_feat)
    jax.block_until_ready(r1)
    r1_ref = (corr_feat.reshape(-1, feat_dim) @ mod1.mix_head_w
              + mod1.mix_head_b).reshape(B, C, out_dim)
    assert p1 is None
    assert jnp.allclose(r1, r1_ref, atol=1e-3, rtol=1e-3)

    print("KERNEL_OK")
</pallas_src>

<mosaic_0001>
module attributes {stable_mosaic.version = 11 : i64} {
  func.func @_filter_factory_kernel(%arg0: i32, %arg1: memref<8x41xbf16, #tpu.memory_space<vmem>>, %arg2: memref<8x4xf32, #tpu.memory_space<vmem>>, %arg3: memref<41x68xbf16, #tpu.memory_space<vmem>>, %arg4: memref<4x64xf32, #tpu.memory_space<vmem>>, %arg5: memref<64x16xf32, #tpu.memory_space<vmem>>, %arg6: memref<8x16xf32, #tpu.memory_space<vmem>>, %arg7: memref<8x4xf32, #tpu.memory_space<vmem>>) attributes {dimension_semantics = [#tpu.dimension_semantics<parallel>], iteration_bounds = array<i64: 1>, scalar_prefetch = 0 : i64, scratch_operands = 0 : i64, tpu.core_type = #tpu.core_type<tc>, window_params = [{transform_indices = @transform_0, window_bounds = array<i64: 8, 41>}, {pipeline_mode = #tpu.pipeline_mode<synchronous>, transform_indices = @transform_1, window_bounds = array<i64: 8, 4>}, {pipeline_mode = #tpu.pipeline_mode<synchronous>, transform_indices = @transform_2, window_bounds = array<i64: 41, 68>}, {pipeline_mode = #tpu.pipeline_mode<synchronous>, transform_indices = @transform_3, window_bounds = array<i64: 4, 64>}, {pipeline_mode = #tpu.pipeline_mode<synchronous>, transform_indices = @transform_4, window_bounds = array<i64: 64, 16>}, {transform_indices = @transform_5, window_bounds = array<i64: 8, 16>}, {transform_indices = @transform_6, window_bounds = array<i64: 8, 4>}]} {
    %c0 = arith.constant 0 : index
    %c0_0 = arith.constant 0 : index
    %0 = vector.load %arg1[%c0, %c0_0] : memref<8x41xbf16, #tpu.memory_space<vmem>>, vector<8x41xbf16>
    %c0_1 = arith.constant 0 : index
    %c0_2 = arith.constant 0 : index
    %1 = vector.load %arg3[%c0_1, %c0_2] : memref<41x68xbf16, #tpu.memory_space<vmem>>, vector<41x68xbf16>
    %cst = arith.constant dense<0.000000e+00> : vector<8x68xf32>
    %2 = tpu.matmul %0, %1, %cst {dimension_numbers = #tpu.dot_dimension_numbers<[1], [0], [0], [1], [0, 0, 1, 1], [], []>} : vector<8x41xbf16>, vector<41x68xbf16>, vector<8x68xf32> -> vector<8x68xf32>
    %3 = vector.extract_strided_slice %2 {offsets = [0, 0], sizes = [8, 4], strides = [1, 1]} : vector<8x68xf32> to vector<8x4xf32>
    %c0_3 = arith.constant 0 : index
    %c0_4 = arith.constant 0 : index
    %4 = vector.load %arg2[%c0_3, %c0_4] : memref<8x4xf32, #tpu.memory_space<vmem>>, vector<8x4xf32>
    %5 = arith.addf %3, %4 : vector<8x4xf32>
    %6 = vector.extract_strided_slice %2 {offsets = [0, 4], sizes = [8, 64], strides = [1, 1]} : vector<8x68xf32> to vector<8x64xf32>
    %cst_5 = arith.constant dense<0xFF800000> : vector<8xf32>
    %7 = vector.multi_reduction <maximumf>, %5, %cst_5 [1] : vector<8x4xf32> to vector<8xf32>
    %8 = vector.shape_cast %7 : vector<8xf32> to vector<8x1xf32>
    %9 = vector.broadcast %8 : vector<8x1xf32> to vector<8x4xf32>
    %10 = arith.subf %5, %9 : vector<8x4xf32>
    %11 = math.exp %10 : vector<8x4xf32>
    %cst_6 = arith.constant dense<0.000000e+00> : vector<8xf32>
    %12 = vector.multi_reduction <add>, %11, %cst_6 [1] : vector<8x4xf32> to vector<8xf32>
    %13 = vector.shape_cast %12 : vector<8xf32> to vector<8x1xf32>
    %14 = vector.broadcast %13 : vector<8x1xf32> to vector<8x4xf32>
    %15 = arith.divf %11, %14 : vector<8x4xf32>
    %c0_7 = arith.constant 0 : index
    %c0_8 = arith.constant 0 : index
    %16 = vector.load %arg7[%c0_7, %c0_8] : memref<8x4xf32, #tpu.memory_space<vmem>>, vector<8x4xf32>
    tpu.vector_store %arg7[%c0_7, %c0_8], %15 {strides = array<i32>} : memref<8x4xf32, #tpu.memory_space<vmem>>, vector<8x4xf32>,
    %c0_9 = arith.constant 0 : index
    %c0_10 = arith.constant 0 : index
    %17 = vector.load %arg4[%c0_9, %c0_10] : memref<4x64xf32, #tpu.memory_space<vmem>>, vector<4x64xf32>
    %cst_11 = arith.constant dense<0.000000e+00> : vector<8x64xf32>
    %18 = tpu.matmul %15, %17, %cst_11 {dimension_numbers = #tpu.dot_dimension_numbers<[1], [0], [0], [1], [0, 0, 1, 1], [], []>} : vector<8x4xf32>, vector<4x64xf32>, vector<8x64xf32> -> vector<8x64xf32>
    %19 = arith.mulf %18, %6 : vector<8x64xf32>
    %c0_12 = arith.constant 0 : index
    %c0_13 = arith.constant 0 : index
    %20 = vector.load %arg5[%c0_12, %c0_13] : memref<64x16xf32, #tpu.memory_space<vmem>>, vector<64x16xf32>
    %cst_14 = arith.constant dense<0.000000e+00> : vector<8x16xf32>
    %21 = tpu.matmul %19, %20, %cst_14 {dimension_numbers = #tpu.dot_dimension_numbers<[1], [0], [0], [1], [0, 0, 1, 1], [], []>} : vector<8x64xf32>, vector<64x16xf32>, vector<8x16xf32> -> vector<8x16xf32>
    %c0_15 = arith.constant 0 : index
    %c0_16 = arith.constant 0 : index
    %22 = vector.load %arg6[%c0_15, %c0_16] : memref<8x16xf32, #tpu.memory_space<vmem>>, vector<8x16xf32>
    tpu.vector_store %arg6[%c0_15, %c0_16], %21 {strides = array<i32>} : memref<8x16xf32, #tpu.memory_space<vmem>>, vector<8x16xf32>,
    return
  }
  func.func @transform_0(%arg0: i32) -> (i32, i32) {
    %c0_i32 = arith.constant 0 : i32
    %c0_i32_0 = arith.constant 0 : i32
    return %arg0, %c0_i32 : i32, i32
  }
  func.func @transform_1(%arg0: i32) -> (i32, i32) {
    %c0_i32 = arith.constant 0 : i32
    %c0_i32_0 = arith.constant 0 : i32
    %c0_i32_1 = arith.constant 0 : i32
    return %c0_i32, %c0_i32_0 : i32, i32
  }
  func.func @transform_2(%arg0: i32) -> (i32, i32) {
    %c0_i32 = arith.constant 0 : i32
    %c0_i32_0 = arith.constant 0 : i32
    %c0_i32_1 = arith.constant 0 : i32
    return %c0_i32, %c0_i32_0 : i32, i32
  }
  func.func @transform_3(%arg0: i32) -> (i32, i32) {
    %c0_i32 = arith.constant 0 : i32
    %c0_i32_0 = arith.constant 0 : i32
    %c0_i32_1 = arith.constant 0 : i32
    return %c0_i32, %c0_i32_0 : i32, i32
  }
  func.func @transform_4(%arg0: i32) -> (i32, i32) {
    %c0_i32 = arith.constant 0 : i32
    %c0_i32_0 = arith.constant 0 : i32
    %c0_i32_1 = arith.constant 0 : i32
    return %c0_i32, %c0_i32_0 : i32, i32
  }
  func.func @transform_5(%arg0: i32) -> (i32, i32) {
    %c0_i32 = arith.constant 0 : i32
    %c0_i32_0 = arith.constant 0 : i32
    return %arg0, %c0_i32 : i32, i32
  }
  func.func @transform_6(%arg0: i32) -> (i32, i32) {
    %c0_i32 = arith.constant 0 : i32
    %c0_i32_0 = arith.constant 0 : i32
    return %arg0, %c0_i32 : i32, i32
  }
}

</mosaic_0001>

<bundles_post_ra>
// kernel: tpu_custom_call.1
= control target key start
LH: loop header
LB: loop body
LE: loop exit
PB: predicated region body
PF: predicated region fallthrough
CT: control target
= control target key end

     0   :  { %v403_v1 = vmov 0.0   ;;  %vm52_vm0 = vcmask 1043456   ;;  %vm53_vm1 = vcmask 1044480   ;;  %v404_v4 = vmov 65535   ;;  %s510_s0 = inlined_call_operand.vmem [shape: bf16[8,41], index: 0, kind: input, shape index: {}]   ;;  %s511_s1 = inlined_call_operand.vmem [shape: f32[8,4], index: 1, kind: input, shape index: {}]   ;;  %s512_s2 = inlined_call_operand.vmem [shape: bf16[41,68], index: 2, kind: input, shape index: {}]   ;;  %s513_s3 = inlined_call_operand.vmem [shape: f32[4,64], index: 3, kind: input, shape index: {}]   ;;  %s514_s4 = inlined_call_operand.vmem [shape: f32[64,16], index: 4, kind: input, shape index: {}]   ;;  %s515_s5 = inlined_call_operand.hbm [shape: f32[8,16], index: 5, kind: output, shape index: {0}]   ;;  %s516_s6 = inlined_call_operand.vmem [shape: f32[8,4], index: 6, kind: output, shape index: {1}]  }
   0x1   :  { %v372_v0 = vld [vmem:[%s512_s2] sm:$0xff]   ;;  %320 = vmatprep.subr.bf16.mxu0 %v403_v1  ;;  %v373_v2 = vld [vmem:[%s512_s2 + $0x8] sm:$0xff]   ;;  %330 = vmatprep.subr.mxu1 %v403_v1  ;;  %v374_v3 = vld [vmem:[%s512_s2 + $0x10] sm:$0x1f]   ;;  %v54_v5 = vsel %vm52_vm0, 4294967295, %v404_v4  ;;  %vm405_vm2 = vmmov 0  }
   0x2   :  { %321 = vmatpush3.bf16.msra.mxu0 %v372_v0  ;;  %326 = vmatprep.mubr.msk.bf16.mxu0 %vm405_vm2, %v403_v1 }
   0x3   :  { %322 = vmatprep.subr.bf16.mxu0 %v403_v1  ;;  %332 = vmatprep.mubr.msk.f32.mxu1 %vm405_vm2, %v403_v1 }
   0x4   :  { %12 = vsyncpa [#allocation3], 0  ;;  %v55_v6 = vsel %vm53_vm1, %v54_v5, 0  ;;  %v24_v8 = vld [vmem:[%s510_s0] sm:$0xf]  ;;  %vm48_vm3 = vcmask 334848  }
   0x5   :  { %v57_v7 = vand.u32 %v374_v3, %v55_v6  ;;  %v99_v9 = vld [vmem:[%s511_s1] sm:$0xff]  ;;  %vm101_vm4 = vcmask 31744   ;;  %s406_s30 = smov 124   ;;  %v407_v22 = vmov 0.0|0.0   ;;  %v197_v25 = vld [vmem:[%s514_s4 + $0x8] sm:$0xff]  ;;  %v198_v29 = vld [vmem:[%s514_s4 + $0x10] sm:$0xff] }
   0x6   :  { %323 = vmatpush3.bf16.msra.mxu0 %v373_v2  ;;  %v114_v21 = vld [vmem:[%s513_s3] sm:$0xf]  ;;  %v199_v30 = vld [vmem:[%s514_s4 + $0x18] sm:$0xff]  ;;  %v201_v33 = vld [vmem:[%s514_s4 + $0x28] sm:$0xff]  ;;  %vm204_vm5 = vcmask 523264   ;;  %s408_s23 = smov [#allocation2]  }
   0x7   :  { %324 = vmatprep.subr.bf16.mxu0 %v403_v1  ;;  %331 = vmatpush3.msk.msra.mxu1 %vm52_vm0, %v114_v21  ;;  %v196_v24 = vld [vmem:[%s514_s4] sm:$0xff]  ;;  %v358_v31 = vpack.c.bf16 %v199_v30, %v198_v29  ;;  %v202_v35 = vld [vmem:[%s514_s4 + $0x30] sm:$0xff]  ;;  %v203_v36 = vld [vmem:[%s514_s4 + $0x38] sm:$0xff]  ;;  %s286_s24 = sshll.u32 %s408_s23, 4  ;;  %vm278_vm6 = vcmask 130048   ;;  %s287_s24 = int_to_ptr.vmem [resolvable:$true] %s286_s24 }
   0x8   :  { %354 = vmatprep.subr.bf16.mxu1 %v407_v22  ;;  %v355_v27 = vpack.c.bf16 %v197_v25, %v196_v24  ;;  %v200_v32 = vld [vmem:[%s514_s4 + $0x20] sm:$0xff]  ;;  %v364_v37 = vpack.c.bf16 %v203_v36, %v202_v35  ;;  %s379_s25 = scalar_lea.vmem %s287_s24, 128  ;;  %p384_p1 = scmp.lt.s32.totalorder %s287_s24, %s287_s24 }
   0x9   :  { %v361_v34 = vpack.c.bf16 %v201_v33, %v200_v32  ;;  %p380_p0 = scmp.ne.s32.totalorder %s287_s24, %s379_s25  ;;  %p385_p2 = scmp.lt.s32.totalorder %s379_s25, %s379_s25 }
   0xa   :  { %325 = vmatpush3.bf16.msra.mxu0 %v57_v7 }
   0xb   :  { %p386_p3 = por %p385_p2, %p384_p1 }
   0xd   :  { %327 = vmatmul.mubr.msk.bf16.vlgmr.msra.gmra.mrb[0].mxu0 %vm48_vm3, %v24_v8  ;;  %p387_p4 = pnand %p386_p3, %p380_p0 }
  0xe0   :  { %v93_v10 = vpop.f32.mrb[0].mxu0 }
  0xe1   :  { %192 = vrot.lane.b32.xlu1 %v93_v10, %s406_s30  ;;  %v328_v11 = vpop.f32.mrb[1].mxu0  ;;  %v100_v12 = vadd.f32 %v99_v9, %v93_v10 }
  0xe2   :  { %v96_v13 = vpop.f32.mrb[2].mxu0 }
  0xe3   :  { %v329_v14 = vpop.f32.mrb[3].mxu0  ;;  %v102_v15 = vsel %vm101_vm4, %v100_v12, -inf }
  0xe4   :  { %103 = vmax.xlane.f32.xlu0 %v102_v15 }
 0x153   :  { %v193_v38 = vpop.permute.xlu1 %192 }
 0x171   :  { %v104_v16 = vpop.xlane.xlu0 %103 }
 0x172   :  { %v105_v17 = vsub.f32 %v100_v12, %v104_v16 }
 0x174   :  { %v106_v18 = vmul.f32 1.442695, %v105_v17 }
 0x176   :  { %375 = vpow2.f32 %v106_v18 }
 0x180   :  { %v376_v19 = vpop.eup %375 }
 0x181   :  { %v108_v20 = vsel %vm101_vm4, %v376_v19, 0.0 }
 0x182   :  { %109 = vadd.xlane.f32.xlu0 %v108_v20 }
 0x20f   :  { %v110_v23 = vpop.xlane.xlu0 %109 }
 0x210   :  { %377 = vrcp.f32 %v110_v23 }
 0x21a   :  { %v378_v26 = vpop.eup %377 }
 0x21b   :  { %v112_v28 = vmul.f32 %v378_v26, %v376_v19 }
 0x21d   :  { %113 = vst.msk [vmem:[%s516_s6] sm:$0xff] %vm101_vm4, %v112_v28  ;;  %333 = vmatmul.mubr.msk.f32.vlgmr.msra.gmra.mrb[0].mxu1 %vm101_vm4, %v112_v28 }
 0x21e   :  { %356 = vmatpush3.bf16.msra.mxu1 %v355_v27  ;;  %351 = vmatprep.mubr.msk.f32.mxu1 %vm405_vm2, %v403_v1 }
 0x21f   :  { %357 = vmatprep.subr.bf16.mxu1 %v407_v22 }
 0x222   :  { %359 = vmatpush3.bf16.msra.mxu1 %v358_v31 }
 0x223   :  { %360 = vmatprep.subr.bf16.mxu1 %v407_v22 }
 0x226   :  { %362 = vmatpush3.bf16.msra.mxu1 %v361_v34 }
 0x227   :  { %363 = vmatprep.subr.bf16.mxu1 %v407_v22 }
 0x22a   :  { %365 = vmatpush3.bf16.msra.mxu1 %v364_v37 }
 0x2f0   :  { %v187_v39 = vpop.f32.mrb[0].mxu1 }
 0x2f1   :  { %v195_v40 = vmul.f32 %v193_v38, %v187_v39  ;;  %v334_v41 = vpop.f32.mrb[1].mxu1 }
 0x2f3   :  { %352 = vmatmul.mubr.msk.f32.vlgmr.msra.gmra.mrb[2].mxu1 %vm204_vm5, %v195_v40 }
 0x3c6   :  { %v274_v42 = vpop.f32.mrb[2].mxu1 }
 0x3c7   :  { %279 = vst.msk [vmem:[#allocation2] sm:$0xff] %vm278_vm6, %v274_v42  ;;  %v353_v43 = vpop.f32.mrb[3].mxu1 }
 0x3c8   :  { %390 = shalt.err (!%p387_p4)
}
 0x3c9   :  { %s391_s27 = scalar_lea.hbm %s515_s5, 128 }
 0x3ca   :  { %p392_p5 = scmp.ne.s32.totalorder %s515_s5, %s391_s27  ;;  %p395_p6 = scmp.lt.u32.totalorder %s391_s27, %s515_s5 }
 0x3cc   :  { %p397_p7 = pnand %p395_p6, %p392_p5 }
 0x3ce   :  { %400 = shalt.err (!%p397_p7)
}
 0x3cf   :  { %289 = dma.vmem_to_hbm [thread:$0]  %s287_s24, 128, %s515_s5, [#allocation3]  }
 0x3d0   :  { %401 = dma.done.wait [#allocation3], 128  }
 0x3d1   :  { %402 = vsyncadd [#allocation3], 4294967168 }
 0x3d2   :  { %297 = vsyncpa [#allocation3], 1 }

</bundles_post_ra>
